<compile_context>
chip_gen: v7x
topology: tpu7x:2x2x1
jax: 0.10.0
libtpu: 0.0.40
codegen_flags: <defaults>
</compile_context>

<pallas_src>
import jax
import jax.numpy as jnp
import numpy as np
from jax import lax
from jax.experimental import pallas as pl
from jax.experimental.pallas import tpu as pltpu


# ----------------------------- Pallas kernel -------------------------------

def _gemm_bias_kernel(w_ref, p_ref, b_ref, o_ref):
    """One lane-dense M-tile of   out^T = W^T @ patches^T + bias.

    w_ref : (Cout, K)  bf16  (whole weight, resident; K is small for this module)
    p_ref : (K, tm)    bf16  (K on sublanes, tm on lanes)
    b_ref : (Cout, 1)  f32
    o_ref : (Cout, tm) f32   (lane-dense -> unmasked full-width vector stores)
    """
    acc = jnp.dot(w_ref[...], p_ref[...], preferred_element_type=jnp.float32)
    o_ref[...] = (acc + b_ref[...]).astype(o_ref.dtype)


def _round_up(v, m):
    return -(-v // m) * m


def _pick_tm(m, tm_max=512):
    """Largest 128-multiple M-tile <= tm_max that still leaves >= 2 grid steps."""
    m128 = _round_up(m, 128)
    if m128 <= 128:
        return 128
    half = _round_up(m128 // 2, 128)
    return int(max(128, min(tm_max, half)))


def _gemm_bias_T(w_t, patches_t, bias, tm_max=512):
    """w_t: (Cout, K), patches_t: (K, M), bias: (Cout,)  ->  (Cout, M) f32."""
    co, k = w_t.shape
    _, m = patches_t.shape
    tm = _pick_tm(m, tm_max)
    grid_m = pl.cdiv(m, tm)            # ragged last tile is masked by Pallas

    w_bf = w_t.astype(jnp.bfloat16)
    p_bf = patches_t.astype(jnp.bfloat16)   # bf16 halves the dominant HBM traffic
    b2 = bias.astype(jnp.float32).reshape(co, 1)

    cost = pl.CostEstimate(
        flops=2 * m * k * co,
        transcendentals=0,
        bytes_accessed=int(p_bf.size * 2 + w_bf.size * 2 + co * m * 4 + co * 4),
    )
    return pl.pallas_call(
        _gemm_bias_kernel,
        out_shape=jax.ShapeDtypeStruct((co, m), jnp.float32),
        grid_spec=pltpu.PrefetchScalarGridSpec(
            num_scalar_prefetch=0,
            grid=(grid_m,),
            in_specs=[
                pl.BlockSpec((co, k), lambda i: (0, 0)),    # full weight
                pl.BlockSpec((k, tm), lambda i: (0, i)),    # lane-dense patch tile
                pl.BlockSpec((co, 1), lambda i: (0, 0)),    # bias column
            ],
            out_specs=pl.BlockSpec((co, tm), lambda i: (0, i)),
        ),
        compiler_params=pltpu.CompilerParams(
            dimension_semantics=("parallel",)),
        cost_estimate=cost,
    )(w_bf, p_bf, b2)


# ------------------------------- conv glue ----------------------------------

def _conv2d(x, w, b, stride, padding):
    """x: (N,Cin,H,W) f32, w: (Cout,Cin,kH,kW), b: (Cout,) -> (N,Cout,Ho,Wo) f32."""
    n, cin, h, wd = x.shape
    cout, _, kh, kw = w.shape
    sh = sw = stride
    pads = ((padding, padding), (padding, padding)) if isinstance(padding, int) else padding
    xp = jnp.pad(x, ((0, 0), (0, 0), pads[0], pads[1]))
    hp = h + pads[0][0] + pads[0][1]
    wp = wd + pads[1][0] + pads[1][1]
    ho = (hp - kh) // sh + 1
    wo = (wp - kw) // sw + 1

    # im2col built directly in the transposed (K, M) layout the kernel consumes:
    #   K = (i, j, ci) on sublanes, M = (n, ho, wo) on lanes.
    # TODO(synk): fully fusing this strided gather into the kernel (kH*kW grid
    # reduction reading shifted windows of x) needs per-row manual DMAs or
    # Element-offset blocks whose lane dim (Wo=8..16) violates the (8,128) rule at
    # these shapes; the gather stays as one fused XLA pass feeding the Pallas GEMM.
    cols = []
    for i in range(kh):
        for j in range(kw):
            cols.append(xp[:, :, i:i + (ho - 1) * sh + 1:sh,
                              j:j + (wo - 1) * sw + 1:sw])
    pat = jnp.stack(cols, axis=0)                 # (kH*kW, N, Cin, Ho, Wo)
    pat = pat.transpose(0, 2, 1, 3, 4)            # (kH*kW, Cin, N, Ho, Wo)
    patches_t = pat.reshape(kh * kw * cin, n * ho * wo)

    # weight in matching K order: w_t[co, (i, j, ci)] = w[co, ci, i, j]
    w_t = w.transpose(0, 2, 3, 1).reshape(cout, kh * kw * cin)

    out_t = _gemm_bias_T(w_t, patches_t, b)       # (Cout, M)  -- Pallas hot path
    return out_t.reshape(cout, n, ho, wo).transpose(1, 0, 2, 3)


def _conv_transpose2d(x, w, b, stride, padding):
    """PyTorch ConvTranspose2d(k=4, s=2, p=1) via sub-pixel decomposition.

    Output phase (a, bph) in {0,1}^2 is a stride-1 2x2-tap conv of x; all four
    phases are folded into ONE stride-1 3x3 conv over x (pad 1) with 4*Cout output
    channels, then interleaved spatially.  w: (Cin, Cout, 4, 4), b: (Cout,).
    """
    n, cin, h, wd = x.shape
    _, cout, kh, kw = w.shape
    assert stride == 2 and padding == 1 and kh == 4 and kw == 4
    # TODO(synk): output_padding is not modeled (Fit never uses it).

    # Expanded 3x3 weights: W3[(a,bph), co, ci, p, q] = w[ci, co, 3-2p+a, 3-2q+bph]
    # for p in {a, a+1}, q in {bph, bph+1}, zero elsewhere.
    w3 = jnp.zeros((2, 2, cout, cin, 3, 3), w.dtype)
    for a in range(2):
        for bph in range(2):
            for p in range(a, a + 2):
                for q in range(bph, bph + 2):
                    tap = w[:, :, 3 - 2 * p + a, 3 - 2 * q + bph].T   # (Cout, Cin)
                    w3 = w3.at[a, bph, :, :, p, q].set(tap)
    w3 = w3.reshape(4 * cout, cin, 3, 3)

    out4 = _conv2d(x, w3, jnp.tile(b, 4), stride=1, padding=1)   # (N, 4*Cout, H, W)

    # interleave: y[n, co, 2t+a, 2u+bph] = out4[n, (2a+bph)*Cout + co, t, u]
    y = out4.reshape(n, 2, 2, cout, h, wd)
    y = y.transpose(0, 3, 4, 1, 5, 2)              # (N, Cout, H, 2, W, 2)
    return y.reshape(n, cout, 2 * h, 2 * wd)


# -------------------------------- Fit module ---------------------------------

def init_fit(key, s_shape, t_shape, factor=1):
    """Parameter init mirroring Fit.__init__ branch logic (PyTorch default init)."""
    _, s_c, s_h, s_w = s_shape
    _, t_c, t_h, t_w = t_shape
    out_c = t_c // factor

    if s_h == 2 * t_h:
        mode, (kh, kw), stride, pad = "conv", (3, 3), 2, 1
        wshape = (out_c, s_c, kh, kw)
    elif s_h * 2 == t_h:
        mode, (kh, kw), stride, pad = "deconv", (4, 4), 2, 1
        wshape = (s_c, out_c, kh, kw)
    elif s_h == t_h:
        mode, (kh, kw), stride, pad = "conv", (1, 1), 1, 0
        wshape = (out_c, s_c, kh, kw)
    else:
        kh, kw = 1 + s_h - t_h, 1 + s_w - t_w
        mode, stride, pad = "conv", 1, 0
        wshape = (out_c, s_c, kh, kw)

    kwk, kbk = jax.random.split(key)
    fan_in = wshape[1] * kh * kw   # matches PyTorch _ConvNd: weight.size(1) * kH * kW
    bound = 1.0 / np.sqrt(fan_in)
    w = jax.random.uniform(kwk, wshape, jnp.float32, -bound, bound)
    b = jax.random.uniform(kbk, (out_c,), jnp.float32, -bound, bound)
    return {"mode": mode, "w": w, "b": b, "stride": stride, "pad": pad}


def fit_forward(params, x):
    if params["mode"] == "conv":
        return _conv2d(x, params["w"], params["b"], params["stride"], params["pad"])
    return _conv_transpose2d(x, params["w"], params["b"], params["stride"], params["pad"])


# ----------------------------------- main ------------------------------------

if __name__ == "__main__":
    key = jax.random.PRNGKey(0)
    kx, kp1, kp2, kp3 = jax.random.split(key, 4)

    s_shape = (2, 4, 16, 16)
    x = jax.random.normal(kx, s_shape, jnp.float32)

    # --- Branch 1: s_H == 2*t_H -> Conv2d(k=3, s=2, p=1) ---
    t_shape = (2, 8, 8, 8)
    params = init_fit(kp1, s_shape, t_shape, factor=1)
    y = jax.block_until_ready(fit_forward(params, x))
    assert y.shape == (2, 8, 8, 8), y.shape
    ref = lax.conv_general_dilated(
        x.astype(jnp.bfloat16), params["w"].astype(jnp.bfloat16),
        window_strides=(2, 2), padding=((1, 1), (1, 1)),
        dimension_numbers=("NCHW", "OIHW", "NCHW"),
        preferred_element_type=jnp.float32,
    ) + params["b"][None, :, None, None]
    np.testing.assert_allclose(np.asarray(y), np.asarray(ref), rtol=1e-2, atol=1e-2)

    # --- Branch 2: s_H*2 == t_H -> ConvTranspose2d(k=4, s=2, p=1) ---
    t_shape_up = (2, 8, 32, 32)
    params_up = init_fit(kp2, s_shape, t_shape_up, factor=1)
    y_up = jax.block_until_ready(fit_forward(params_up, x))
    assert y_up.shape == (2, 8, 32, 32), y_up.shape
    w_eq = jnp.flip(params_up["w"], axis=(2, 3)).transpose(1, 0, 2, 3)  # (Cout,Cin,4,4)
    ref_up = lax.conv_general_dilated(
        x.astype(jnp.bfloat16), w_eq.astype(jnp.bfloat16),
        window_strides=(1, 1), padding=((2, 2), (2, 2)), lhs_dilation=(2, 2),
        dimension_numbers=("NCHW", "OIHW", "NCHW"),
        preferred_element_type=jnp.float32,
    ) + params_up["b"][None, :, None, None]
    np.testing.assert_allclose(np.asarray(y_up), np.asarray(ref_up), rtol=1e-2, atol=1e-2)

    # --- Branch 3: s_H == t_H -> Conv2d(k=1, s=1, p=0) ---
    t_shape_same = (2, 8, 16, 16)
    params_same = init_fit(kp3, s_shape, t_shape_same, factor=1)
    y_same = jax.block_until_ready(fit_forward(params_same, x))
    assert y_same.shape == (2, 8, 16, 16), y_same.shape
    ref_same = lax.conv_general_dilated(
        x.astype(jnp.bfloat16), params_same["w"].astype(jnp.bfloat16),
        window_strides=(1, 1), padding=((0, 0), (0, 0)),
        dimension_numbers=("NCHW", "OIHW", "NCHW"),
        preferred_element_type=jnp.float32,
    ) + params_same["b"][None, :, None, None]
    np.testing.assert_allclose(np.asarray(y_same), np.asarray(ref_same), rtol=1e-2, atol=1e-2)

    print("KERNEL_OK")
</pallas_src>

<mosaic_0001>
module attributes {stable_mosaic.version = 11 : i64} {
  func.func @_gemm_bias_kernel(%arg0: i32, %arg1: memref<8x36xbf16, #tpu.memory_space<vmem>>, %arg2: memref<36x128xbf16, #tpu.memory_space<vmem>>, %arg3: memref<8x1xf32, #tpu.memory_space<vmem>>, %arg4: memref<8x128xf32, #tpu.memory_space<vmem>>) attributes {dimension_semantics = [#tpu.dimension_semantics<parallel>], iteration_bounds = array<i64: 1>, scalar_prefetch = 0 : i64, scratch_operands = 0 : i64, tpu.core_type = #tpu.core_type<tc>, window_params = [{pipeline_mode = #tpu.pipeline_mode<synchronous>, transform_indices = @transform_0, window_bounds = array<i64: 8, 36>}, {transform_indices = @transform_1, window_bounds = array<i64: 36, 128>}, {pipeline_mode = #tpu.pipeline_mode<synchronous>, transform_indices = @transform_2, window_bounds = array<i64: 8, 1>}, {transform_indices = @transform_3, window_bounds = array<i64: 8, 128>}]} {
    %c0 = arith.constant 0 : index
    %c0_0 = arith.constant 0 : index
    %0 = vector.load %arg1[%c0, %c0_0] : memref<8x36xbf16, #tpu.memory_space<vmem>>, vector<8x36xbf16>
    %c0_1 = arith.constant 0 : index
    %c0_2 = arith.constant 0 : index
    %1 = vector.load %arg2[%c0_1, %c0_2] : memref<36x128xbf16, #tpu.memory_space<vmem>>, vector<36x128xbf16>
    %cst = arith.constant dense<0.000000e+00> : vector<8x128xf32>
    %2 = tpu.matmul %0, %1, %cst {dimension_numbers = #tpu.dot_dimension_numbers<[1], [0], [0], [1], [0, 0, 1, 1], [], []>} : vector<8x36xbf16>, vector<36x128xbf16>, vector<8x128xf32> -> vector<8x128xf32>
    %c0_3 = arith.constant 0 : index
    %c0_4 = arith.constant 0 : index
    %3 = vector.load %arg3[%c0_3, %c0_4] : memref<8x1xf32, #tpu.memory_space<vmem>>, vector<8x1xf32>
    %4 = vector.broadcast %3 : vector<8x1xf32> to vector<8x128xf32>
    %5 = arith.addf %2, %4 : vector<8x128xf32>
    %c0_5 = arith.constant 0 : index
    %c0_6 = arith.constant 0 : index
    %6 = vector.load %arg4[%c0_5, %c0_6] : memref<8x128xf32, #tpu.memory_space<vmem>>, vector<8x128xf32>
    tpu.vector_store %arg4[%c0_5, %c0_6], %5 {strides = array<i32>} : memref<8x128xf32, #tpu.memory_space<vmem>>, vector<8x128xf32>,
    return
  }
  func.func @transform_0(%arg0: i32) -> (i32, i32) {
    %c0_i32 = arith.constant 0 : i32
    %c0_i32_0 = arith.constant 0 : i32
    %c0_i32_1 = arith.constant 0 : i32
    return %c0_i32, %c0_i32_0 : i32, i32
  }
  func.func @transform_1(%arg0: i32) -> (i32, i32) {
    %c0_i32 = arith.constant 0 : i32
    %c0_i32_0 = arith.constant 0 : i32
    return %c0_i32, %arg0 : i32, i32
  }
  func.func @transform_2(%arg0: i32) -> (i32, i32) {
    %c0_i32 = arith.constant 0 : i32
    %c0_i32_0 = arith.constant 0 : i32
    %c0_i32_1 = arith.constant 0 : i32
    return %c0_i32, %c0_i32_0 : i32, i32
  }
  func.func @transform_3(%arg0: i32) -> (i32, i32) {
    %c0_i32 = arith.constant 0 : i32
    %c0_i32_0 = arith.constant 0 : i32
    return %c0_i32, %arg0 : i32, i32
  }
}

</mosaic_0001>

<bundles_post_ra>
// kernel: tpu_custom_call.1
= control target key start
LH: loop header
LB: loop body
LE: loop exit
PB: predicated region body
PF: predicated region fallthrough
CT: control target
= control target key end

     0   :  { %8 = vsyncpa [#allocation3], 0  ;;  %s255_s0 = inlined_call_operand.vmem [shape: bf16[8,36], index: 0, kind: input, shape index: {}]   ;;  %s256_s1 = inlined_call_operand.hbm [shape: bf16[36,128], index: 1, kind: input, shape index: {}]   ;;  %s257_s2 = inlined_call_operand.vmem [shape: f32[8,1], index: 2, kind: input, shape index: {}]   ;;  %s258_s3 = inlined_call_operand.hbm [shape: f32[8,128], index: 3, kind: output, shape index: {}]  }
   0x1   :  { %9 = vsyncpa [#allocation4], 0  ;;  %s198_s12 = smov [#allocation2]   ;;  %s150_s16 = scalar_lea.hbm %s256_s1, 320 }
   0x2   :  { %s17_s13 = sshll.u32 %s198_s12, 4  ;;  %p151_p0 = scmp.ne.s32.totalorder %s256_s1, %s150_s16  ;;  %s18_s13 = int_to_ptr.vmem [resolvable:$true] %s17_s13 }
   0x3   :  { %p154_p1 = scmp.lt.u32.totalorder %s150_s16, %s256_s1 }
   0x5   :  { %p156_p2 = pnand %p154_p1, %p151_p0 }
   0x7   :  { %159 = shalt.err (!%p156_p2)
}
   0x8   :  { %s160_s21 = scalar_lea.vmem %s18_s13, 320  ;;  %p165_p4 = scmp.lt.s32.totalorder %s18_s13, %s18_s13 }
   0x9   :  { %p161_p3 = scmp.ne.s32.totalorder %s18_s13, %s160_s21  ;;  %p166_p5 = scmp.lt.s32.totalorder %s160_s21, %s160_s21 }
   0xb   :  { %p167_p6 = por %p166_p5, %p165_p4 }
   0xd   :  { %p168_p7 = pnand %p167_p6, %p161_p3 }
   0xf   :  { %171 = shalt.err (!%p168_p7)
}
  0x10   :  { %s199_s22 = smov 64   ;;  %s200_s23 = smov 4  }
  0x11   :  { %23 = dma.hbm_to_vmem [thread:$0]  %s256_s1, 320, %s18_s13, [#allocation3], %s199_s22, %s199_s22, %s200_s23  }
  0x12   :  { %194 = dma.done.wait [#allocation3], 320  }
  0x13   :  { %195 = vsyncadd [#allocation3], 4294966976  ;;  %v201_v0 = vmov 0.0   ;;  %vm202_vm0 = vmmov 0   ;;  %v203_v1 = vmov 0   ;;  %v147_v2 = vld [vmem:[#allocation2] sm:$0xff]  }
  0x14   :  { %129 = vmatprep.subr.bf16.mxu0 %v201_v0  ;;  %135 = vmatprep.mubr.msk.bf16.mxu0 %vm202_vm0, %v201_v0  ;;  %v148_v3 = vld [vmem:[#allocation2 + $0x8] sm:$0xff]   ;;  %v36_v4 = vld [vmem:[%s257_s2] sm:$0xff]  ;;  %v149_v5 = vld [vmem:[#allocation2 + $0x10] ss:$0 sps:$4 sm:$0x33]   ;;  %vm61_vm1 = vcmask 1041408  }
  0x15   :  { %146 = vset.pattern.permute.xlu0 %v203_v1  ;;  %130 = vmatpush3.bf16.msra.mxu0 %v147_v2  ;;  %v63_v6 = vsel %vm61_vm1, %v149_v5, 0  ;;  %v30_v7 = vld [vmem:[%s255_s0] sm:$0xf]  ;;  %vm57_vm2 = vcmask 293888   ;;  %s204_s29 = smov [#allocation5]  }
  0x16   :  { %131 = vmatprep.subr.bf16.mxu0 %v201_v0  ;;  %39 = vperm.xlu0 %146, %v36_v4   ;;  %s112_s30 = sshll.u32 %s204_s29, 4  ;;  %s113_s30 = int_to_ptr.vmem [resolvable:$true] %s112_s30 }
  0x17   :  { %s172_s2 = scalar_lea.vmem %s113_s30, 128  ;;  %p177_p9 = scmp.lt.s32.totalorder %s113_s30, %s113_s30 }
  0x18   :  { %p173_p8 = scmp.ne.s32.totalorder %s113_s30, %s172_s2  ;;  %p178_p10 = scmp.lt.s32.totalorder %s172_s2, %s172_s2 }
  0x19   :  { %132 = vmatpush3.bf16.msra.mxu0 %v148_v3 }
  0x1a   :  { %133 = vmatprep.subr.bf16.mxu0 %v201_v0  ;;  %p179_p11 = por %p178_p10, %p177_p9 }
  0x1c   :  { %p180_p12 = pnand %p179_p11, %p173_p8 }
  0x1d   :  { %134 = vmatpush3.bf16.msra.mxu0 %v63_v6 }
  0x20   :  { %136 = vmatmul.mubr.msk.bf16.vlgmr.msra.gmra.mrb[0].mxu0 %vm57_vm2, %v30_v7 }
  0x95   :  { %v40_v8 = vpop.permute.xlu0 %39 }
  0xf3   :  { %v99_v9 = vpop.f32.mrb[0].mxu0 }
  0xf4   :  { %v100_v10 = vadd.f32 %v99_v9, %v40_v8  ;;  %v137_v11 = vpop.f32.mrb[1].mxu0 }
  0xf5   :  { %v102_v12 = vpop.f32.mrb[2].mxu0 }
  0xf6   :  { %105 = vst [vmem:[#allocation5] sm:$0xff] %v100_v10  ;;  %v138_v13 = vpop.f32.mrb[3].mxu0 }
  0xf7   :  { %183 = shalt.err (!%p180_p12)
}
  0xf8   :  { %s184_s5 = scalar_lea.hbm %s258_s3, 128 }
  0xf9   :  { %p185_p13 = scmp.ne.s32.totalorder %s258_s3, %s184_s5  ;;  %p188_p0 = scmp.lt.u32.totalorder %s184_s5, %s258_s3 }
  0xfb   :  { %p190_p1 = pnand %p188_p0, %p185_p13 }
  0xfd   :  { %193 = shalt.err (!%p190_p1)
}
  0xfe   :  { %115 = dma.vmem_to_hbm [thread:$0]  %s113_s30, 128, %s258_s3, [#allocation4]  }
  0xff   :  { %196 = dma.done.wait [#allocation4], 128  }
 0x100   :  { %197 = vsyncadd [#allocation4], 4294967168 }
 0x101   :  { %119 = vsyncpa [#allocation3], 1 }
 0x102   :  { %120 = vsyncpa [#allocation4], 1 }

</bundles_post_ra>
